<compile_context>
chip_gen: v7x
topology: tpu7x:2x2x1
jax: 0.10.0
libtpu: 0.0.40
codegen_flags: <defaults>
</compile_context>

<pallas_src>
import numpy as np
import jax
import jax.numpy as jnp
from jax.experimental import pallas as pl
from jax.experimental.pallas import tpu as pltpu

BN_EPS = 1e-5
LANE = 128


def _round_up(x, m):
    return (x + m - 1) // m * m


def _vmem_limit_bytes():
    """75% of physical VMEM (capped): ~48 MiB on v7x, ~96 MiB on v5e/v6e."""
    try:
        cap = int(pltpu.get_tpu_info().vmem_capacity_bytes)
    except Exception:
        cap = 64 * 1024 * 1024
    return max(32 * 1024 * 1024, min(cap * 3 // 4, 112 * 1024 * 1024))


def _choose_band(n, cap, multiple=1, prefer_even_count=False):
    """Largest divisor of n that is <= cap and a multiple of `multiple`.
    Prefers an even band count when requested (megacore with N == 1).  Falls
    back to the full extent only when no such divisor exists (always legal)."""
    cap = min(cap, n)
    if cap >= n:
        return n
    best = None
    best_even = None
    d = multiple
    while d <= cap:
        if n % d == 0:
            best = d
            if (n // d) % 2 == 0:
                best_even = d
        d += multiple
    if prefer_even_count and best_even is not None:
        return best_even
    if best is not None:
        return best
    return n


def _conv_row_band(H, W, Cinp, Cp, N, vmem_limit):
    budget = max(vmem_limit // 4, 2 * 1024 * 1024)
    # slab bf16 (+one relayout copy) + f32 acc + double-buffered bf16 out band
    per_row = W * (9 * Cinp * 2 * 2 + Cp * 4 + 2 * Cp * 2 * 2)
    cap = max(1, min(budget // per_row, max(1, 2048 // max(W, 1))))
    return _choose_band(H, cap, multiple=1, prefer_even_count=(N == 1))


def _ups_row_band(Ho, WoCp, N, vmem_limit):
    budget = max(vmem_limit // 4, 2 * 1024 * 1024)
    # f32 rows + f32 skip cast + double-buffered bf16 skip and out bands
    per_row = WoCp * (4 + 4 + 2 * 2 * 2 + 2 * 2)
    cap = max(8, budget // per_row)
    # THo must be a multiple of 8 (or the full extent) for the flattened
    # (THo, Wo*Cp) block shapes.
    return _choose_band(Ho, cap, multiple=8, prefer_even_count=(N == 1))


# -----------------------------------------------------------------------------
# Kernel 1: fused 3x3 conv (pad=1, stride=1) + folded BatchNorm + ReLU   (NHWC)
# -----------------------------------------------------------------------------
def _conv3x3_bn_relu_kernel(x_ref, w_ref, scale_ref, bias_ref, out_ref):
    """One TH-row output band per grid step, single MXU matmul per band.

    x_ref:     (1, H, W, Cinp)   bf16 un-padded image, resident across bands
    w_ref:     (9*Cinp, Cp)      bf16 weights, (ky,kx,ci) folded into K
    scale_ref: (1, Cp)  f32      folded BatchNorm scale (0 on padded channels)
    bias_ref:  (1, Cp)  f32      folded BatchNorm bias  (0 on padded channels)
    out_ref:   (1, TH, W, Cp)    bf16 output band (lane-dense, Cp % 128 == 0)
    """
    TH, W, Cp = out_ref.shape[1], out_ref.shape[2], out_ref.shape[3]
    H, Cin = x_ref.shape[1], x_ref.shape[3]
    h0 = pl.program_id(1) * TH

    # In-kernel halo: rows h0-1 .. h0+TH with zero rows at the image border
    # (no separate jnp.pad pass over HBM).
    mid = x_ref[0, pl.ds(h0, TH), :, :]                            # (TH, W, Cin)
    top = x_ref[0, pl.ds(jnp.maximum(h0 - 1, 0), 1), :, :]         # (1, W, Cin)
    bot = x_ref[0, pl.ds(jnp.minimum(h0 + TH, H - 1), 1), :, :]    # (1, W, Cin)
    zrow = jnp.zeros_like(top)
    top = jnp.where(h0 > 0, top, zrow)
    bot = jnp.where(h0 + TH < H, bot, zrow)
    rows = jnp.concatenate([top, mid, bot], axis=0)                # (TH+2, W, Cin)

    # kx taps as whole-band shifted copies (zero column halo), lane dim intact.
    zcol = jnp.zeros((TH + 2, 1, Cin), rows.dtype)
    taps_x = (jnp.concatenate([zcol, rows[:, :W - 1, :]], axis=1),   # kx = 0
              rows,                                                  # kx = 1
              jnp.concatenate([rows[:, 1:, :], zcol], axis=1))       # kx = 2

    # Fold (ky, kx, ci) into K = 9*Cinp: lane-aligned concat (Cinp % 128 == 0).
    parts = [taps_x[kx][ky:ky + TH, :, :] for ky in range(3) for kx in range(3)]
    slab = jnp.concatenate(parts, axis=-1).reshape(TH * W, 9 * Cin)

    acc = jnp.dot(slab, w_ref[...], preferred_element_type=jnp.float32)
    y = jnp.maximum(acc * scale_ref[...] + bias_ref[...], 0.0)
    out_ref[0, :, :, :] = y.reshape(TH, W, Cp).astype(out_ref.dtype)


def conv3x3_bn_relu(x_nhwc, w9, scale, bias, vmem_limit):
    """DeformConv block approximated as 3x3 conv -> folded BN -> ReLU (bf16 NHWC)."""
    N, H, W, Cinp = x_nhwc.shape
    Cp = w9.shape[1]
    assert w9.shape[0] == 9 * Cinp and Cinp % LANE == 0 and Cp % LANE == 0

    TH = _conv_row_band(H, W, Cinp, Cp, N, vmem_limit)
    return pl.pallas_call(
        _conv3x3_bn_relu_kernel,
        out_shape=jax.ShapeDtypeStruct((N, H, W, Cp), jnp.bfloat16),
        grid=(N, H // TH),
        in_specs=[
            pl.BlockSpec((1, H, W, Cinp), lambda n, b: (n, 0, 0, 0)),
            pl.BlockSpec((9 * Cinp, Cp), lambda n, b: (0, 0)),
            pl.BlockSpec((1, Cp), lambda n, b: (0, 0)),
            pl.BlockSpec((1, Cp), lambda n, b: (0, 0)),
        ],
        out_specs=pl.BlockSpec((1, TH, W, Cp), lambda n, b: (n, b, 0, 0)),
        compiler_params=pltpu.CompilerParams(
            dimension_semantics=("parallel", "parallel"),
            vmem_limit_bytes=vmem_limit),
    )(x_nhwc, w9, scale, bias)


# -----------------------------------------------------------------------------
# Kernel 2: depthwise bilinear ConvTranspose2d (fixed fill_up_weights) + skip add
# -----------------------------------------------------------------------------
def _upsample_add_kernel(x_ref, skip_ref, uy_ref, out_ref, xu_ref):
    """One THo-row output band per grid step; no transposes, Cp stays on lanes.

    x_ref:    (1, H, W, Cp)    bf16 low-res image, resident across bands
    skip_ref: (1, THo, Wo*Cp)  bf16 skip band (lane-flattened)
    uy_ref:   (THo, H)         bf16 row-upsampling matrix rows for this band
    out_ref:  (1, THo, Wo*Cp)  bf16
    xu_ref:   (H, Wo*Cp)       bf16 VMEM scratch: column-upsampled image,
                               built once per image at band 0 (2-tap VPU).
    """
    H, W, Cp = x_ref.shape[1], x_ref.shape[2], x_ref.shape[3]
    THo, WoCp = out_ref.shape[1], out_ref.shape[2]
    f = WoCp // (W * Cp)                          # static upsampling factor
    c = (2 * f - 1 - f % 2) / (2.0 * f)
    g = [1.0 - abs(k / f - c) for k in range(2 * f)]   # separable bilinear taps

    @pl.when(pl.program_id(1) == 0)
    def _():
        # 2-tap column upsample of the (small) low-res image, channels on lanes.
        x = x_ref[0, :, :, :].astype(jnp.float32)                    # (H, W, Cp)
        zero = jnp.zeros((H, 1, Cp), jnp.float32)
        xm1 = jnp.concatenate([zero, x[:, :W - 1, :]], axis=1)       # x[:, w-1, :]
        xp1 = jnp.concatenate([x[:, 1:, :], zero], axis=1)           # x[:, w+1, :]
        phases = []
        for p in range(f):                                           # static unroll
            if p < f // 2:
                phases.append(g[p + 3 * f // 2] * xm1 + g[p + f // 2] * x)
            else:
                phases.append(g[p + f // 2] * x + g[p - f // 2] * xp1)
        # Lane-aligned phase concat (Cp % 128 == 0) then flatten to (H, Wo*Cp):
        # lane index (w*f + p)*Cp + c matches the interleaved output layout.
        xu = jnp.concatenate(phases, axis=-1)                        # (H, W, f*Cp)
        xu_ref[...] = xu.reshape(H, WoCp).astype(xu_ref.dtype)

    # Row upsample + skip add: one lane-dense matmul per band, lane-dense store.
    rows = jnp.dot(uy_ref[...], xu_ref[...],
                   preferred_element_type=jnp.float32)               # (THo, Wo*Cp)
    out_ref[0, :, :] = (rows + skip_ref[0, :, :].astype(jnp.float32)
                        ).astype(out_ref.dtype)


_BILINEAR_CACHE = {}


def _bilinear_matrix(out_size, in_size, f):
    """Exact 1-D matrix of ConvTranspose2d(o,o,2f,stride=f,pad=f//2,groups=o)
    whose weights were set by fill_up_weights (separable bilinear kernel)."""
    key = (out_size, in_size, f)
    if key not in _BILINEAR_CACHE:
        K = 2 * f
        pad = f // 2
        c = (2 * f - 1 - f % 2) / (2.0 * f)
        g = np.array([1.0 - abs(k / f - c) for k in range(K)], dtype=np.float32)
        U = np.zeros((out_size, in_size), dtype=np.float32)
        for o_ in range(out_size):
            for i_ in range(in_size):
                k = o_ + pad - i_ * f
                if 0 <= k < K:
                    U[o_, i_] = g[k]
        _BILINEAR_CACHE[key] = U
    return _BILINEAR_CACHE[key]


def bilinear_upsample_add(x_nhwc, skip_nhwc, f, vmem_limit):
    """up(x) + skip, where up is the fixed fill_up_weights ConvTranspose2d."""
    N, H, W, Cp = x_nhwc.shape
    Ho, Wo = H * f, W * f
    # TODO(synk): only even f matches PyTorch's ConvTranspose2d output size H*f
    # (IDAUp.forward never uses the f=1 entry of up_f); odd f is not implemented.
    assert f % 2 == 0 and f >= 2, "bilinear upsample implemented for even up_f only"
    assert skip_nhwc.shape == (N, Ho, Wo, Cp)

    uy = jnp.asarray(_bilinear_matrix(Ho, H, f), dtype=jnp.bfloat16)
    WoCp = Wo * Cp
    skip2d = skip_nhwc.reshape(N, Ho, WoCp)       # free reshape in HBM layout
    THo = _ups_row_band(Ho, WoCp, N, vmem_limit)

    out2d = pl.pallas_call(
        _upsample_add_kernel,
        out_shape=jax.ShapeDtypeStruct((N, Ho, WoCp), jnp.bfloat16),
        grid=(N, Ho // THo),
        in_specs=[
            pl.BlockSpec((1, H, W, Cp), lambda n, b: (n, 0, 0, 0)),
            pl.BlockSpec((1, THo, WoCp), lambda n, b: (n, b, 0)),
            pl.BlockSpec((THo, H), lambda n, b: (b, 0)),
        ],
        out_specs=pl.BlockSpec((1, THo, WoCp), lambda n, b: (n, b, 0)),
        scratch_shapes=[pltpu.VMEM((H, WoCp), jnp.bfloat16)],
        compiler_params=pltpu.CompilerParams(
            # band axis is "arbitrary": the xu scratch built at band 0 is reused
            # by the later bands of the same image.
            dimension_semantics=("parallel", "arbitrary"),
            vmem_limit_bytes=vmem_limit),
    )(x_nhwc, skip2d, uy)
    return out2d.reshape(N, Ho, Wo, Cp)           # free reshape in HBM layout


# -----------------------------------------------------------------------------
# IDAUp
# -----------------------------------------------------------------------------
class IDAUpPallas:
    """Pallas/TPU IDAUp. NCHW f32 at the module boundary; NHWC bf16 with the
    channel dims zero-padded to multiples of 128 inside the chain."""

    def __init__(self, o, channels, up_f, key):
        self.o = o
        self.cp = _round_up(o, LANE)
        self.channels = list(channels)
        self.up_f = [int(f) for f in up_f]
        self.vmem_limit = _vmem_limit_bytes()
        self.cinp = {}
        self.params = {}
        for i in range(1, len(channels)):
            c = channels[i]
            cinp = _round_up(c, LANE)             # lane-aligned in-channels (opt 2)
            self.cinp[i] = cinp
            key, k1, k2, k3, k4, k5, k6 = jax.random.split(key, 7)
            self.params[f"proj_{i}"] = self._make_conv_params(k1, k2, k3,
                                                              cin=c, cin_pad=cinp)
            self.params[f"node_{i}"] = self._make_conv_params(k4, k5, k6,
                                                              cin=o, cin_pad=self.cp)
            # up_i weights are the fixed fill_up_weights bilinear kernel; they are
            # realized exactly by the Uy matrix + in-kernel 2-tap column taps.

    def _make_conv_params(self, kw, kg, kb, cin, cin_pad):
        o, cp = self.o, self.cp
        w = 0.1 * jax.random.normal(kw, (o, cin, 3, 3), jnp.float32)
        gamma = 1.0 + 0.1 * jax.random.normal(kg, (o,), jnp.float32)
        beta = 0.1 * jax.random.normal(kb, (o,), jnp.float32)
        mean = jnp.zeros((o,), jnp.float32)       # fresh BN running stats (eval mode)
        var = jnp.ones((o,), jnp.float32)
        # Fold BN into per-channel scale/bias; zero on padded lanes so padded
        # channels stay exactly 0 through ReLU / upsample / add.
        scale = gamma / jnp.sqrt(var + BN_EPS)
        bias = beta - mean * scale
        scale = jnp.pad(scale, (0, cp - o))[None, :].astype(jnp.float32)
        bias = jnp.pad(bias, (0, cp - o))[None, :].astype(jnp.float32)
        # (Cout, Cin, 3, 3) -> (9*cin_pad, cp): row index = (ky*3+kx)*cin_pad + ci,
        # matching the in-kernel (ky, kx)-folded slab layout.
        w9 = jnp.transpose(w, (2, 3, 1, 0))                       # (ky, kx, Cin, Cout)
        w9 = jnp.pad(w9, ((0, 0), (0, 0), (0, cin_pad - cin), (0, cp - o)))
        w9 = w9.reshape(9 * cin_pad, cp).astype(jnp.bfloat16)
        return dict(w9=w9, scale=scale, bias=bias)

    def _to_padded_nhwc(self, x_nchw, cpad):
        n, c, h, w = x_nchw.shape
        x = jnp.transpose(x_nchw, (0, 2, 3, 1)).astype(jnp.bfloat16)
        return jnp.pad(x, ((0, 0), (0, 0), (0, 0), (0, cpad - c)))

    def __call__(self, layers, startp, endp):
        out = list(layers)
        assert layers[startp].shape[1] == self.o
        # Skip path stays channel-padded NHWC bf16 end-to-end: no per-stage
        # transposes and no channel slicing between the kernels of a level.
        prev = self._to_padded_nhwc(layers[startp], self.cp)
        for i in range(startp + 1, endp):
            j = i - startp
            p = self.params[f"proj_{j}"]
            nd = self.params[f"node_{j}"]
            f = self.up_f[j]
            x = self._to_padded_nhwc(layers[i], self.cinp[j])
            x = conv3x3_bn_relu(x, p["w9"], p["scale"], p["bias"],
                                self.vmem_limit)                       # proj
            x = bilinear_upsample_add(x, prev, f, self.vmem_limit)      # up + skip add
            prev = conv3x3_bn_relu(x, nd["w9"], nd["scale"], nd["bias"],
                                   self.vmem_limit)                     # node
            out[i] = jnp.transpose(prev[..., :self.o],
                                   (0, 3, 1, 2)).astype(jnp.float32)
        return out


if __name__ == "__main__":
    key = jax.random.PRNGKey(0)
    o = 4
    channels = [4, 8, 16]
    up_f = [1, 2, 4]
    N, S = 2, 16

    key, ka, kb, kc, kp = jax.random.split(key, 5)
    layers = [
        jax.random.normal(ka, (N, channels[0], S, S), jnp.float32),
        jax.random.normal(kb, (N, channels[1], S // 2, S // 2), jnp.float32),
        jax.random.normal(kc, (N, channels[2], S // 4, S // 4), jnp.float32),
    ]

    ida = IDAUpPallas(o, channels, up_f, kp)
    out_layers = ida(layers, 0, len(layers))

    for t in out_layers:
        jax.block_until_ready(t)

    assert out_layers[1].shape == (N, o, S, S)
    assert out_layers[2].shape == (N, o, S, S)
    assert all(bool(jnp.isfinite(t).all()) for t in out_layers[1:])
    print("KERNEL_OK")
</pallas_src>

<mosaic_0001>
module attributes {stable_mosaic.version = 11 : i64} {
  func.func @_conv3x3_bn_relu_kernel(%arg0: i32, %arg1: i32, %arg2: memref<1x8x8x128xbf16, #tpu.memory_space<vmem>>, %arg3: memref<1152x128xbf16, #tpu.memory_space<vmem>>, %arg4: memref<1x128xf32, #tpu.memory_space<vmem>>, %arg5: memref<1x128xf32, #tpu.memory_space<vmem>>, %arg6: memref<1x8x8x128xbf16, #tpu.memory_space<vmem>>) attributes {dimension_semantics = [#tpu.dimension_semantics<parallel>, #tpu.dimension_semantics<parallel>], iteration_bounds = array<i64: 2, 1>, scalar_prefetch = 0 : i64, scratch_operands = 0 : i64, tpu.core_type = #tpu.core_type<tc>, window_params = [{transform_indices = @transform_0, window_bounds = array<i64: 1, 8, 8, 128>}, {pipeline_mode = #tpu.pipeline_mode<synchronous>, transform_indices = @transform_1, window_bounds = array<i64: 1152, 128>}, {pipeline_mode = #tpu.pipeline_mode<synchronous>, transform_indices = @transform_2, window_bounds = array<i64: 1, 128>}, {pipeline_mode = #tpu.pipeline_mode<synchronous>, transform_indices = @transform_3, window_bounds = array<i64: 1, 128>}, {transform_indices = @transform_4, window_bounds = array<i64: 1, 8, 8, 128>}]} {
    %c8_i32 = arith.constant 8 : i32
    %0 = arith.muli %arg1, %c8_i32 : i32
    %c0 = arith.constant 0 : index
    %1 = arith.index_cast %0 : i32 to index
    %c0_0 = arith.constant 0 : index
    %c0_1 = arith.constant 0 : index
    %2 = vector.load %arg2[%c0, %1, %c0_0, %c0_1] : memref<1x8x8x128xbf16, #tpu.memory_space<vmem>>, vector<1x8x8x128xbf16>
    %3 = vector.shape_cast %2 : vector<1x8x8x128xbf16> to vector<8x8x128xbf16>
    %c1_i32 = arith.constant 1 : i32
    %4 = arith.subi %0, %c1_i32 : i32
    %c0_i32 = arith.constant 0 : i32
    %5 = arith.maxsi %4, %c0_i32 : i32
    %c0_2 = arith.constant 0 : index
    %6 = arith.index_cast %5 : i32 to index
    %c0_3 = arith.constant 0 : index
    %c0_4 = arith.constant 0 : index
    %7 = vector.load %arg2[%c0_2, %6, %c0_3, %c0_4] : memref<1x8x8x128xbf16, #tpu.memory_space<vmem>>, vector<1x1x8x128xbf16>
    %8 = vector.shape_cast %7 : vector<1x1x8x128xbf16> to vector<1x8x128xbf16>
    %c8_i32_5 = arith.constant 8 : i32
    %9 = arith.addi %0, %c8_i32_5 : i32
    %c7_i32 = arith.constant 7 : i32
    %10 = arith.minsi %9, %c7_i32 : i32
    %c0_6 = arith.constant 0 : index
    %11 = arith.index_cast %10 : i32 to index
    %c0_7 = arith.constant 0 : index
    %c0_8 = arith.constant 0 : index
    %12 = vector.load %arg2[%c0_6, %11, %c0_7, %c0_8] : memref<1x8x8x128xbf16, #tpu.memory_space<vmem>>, vector<1x1x8x128xbf16>
    %13 = vector.shape_cast %12 : vector<1x1x8x128xbf16> to vector<1x8x128xbf16>
    %cst = arith.constant 0.000000e+00 : bf16
    %14 = vector.broadcast %cst : bf16 to vector<1x8x128xbf16>
    %c0_i32_9 = arith.constant 0 : i32
    %15 = arith.cmpi sgt, %0, %c0_i32_9 : i32
    %16 = arith.select %15, %8, %14 : vector<1x8x128xbf16>
    %c8_i32_10 = arith.constant 8 : i32
    %17 = arith.addi %0, %c8_i32_10 : i32
    %c8_i32_11 = arith.constant 8 : i32
    %18 = arith.cmpi slt, %17, %c8_i32_11 : i32
    %19 = arith.select %18, %13, %14 : vector<1x8x128xbf16>
    %20 = tpu.concatenate %16, %3, %19 in 0 : vector<1x8x128xbf16>, vector<8x8x128xbf16>, vector<1x8x128xbf16> -> vector<10x8x128xbf16>
    %cst_12 = arith.constant 0.000000e+00 : bf16
    %21 = vector.broadcast %cst_12 : bf16 to vector<10x1x128xbf16>
    %22 = vector.extract_strided_slice %20 {offsets = [0, 0, 0], sizes = [10, 7, 128], strides = [1, 1, 1]} : vector<10x8x128xbf16> to vector<10x7x128xbf16>
    %23 = tpu.concatenate %21, %22 in 1 : vector<10x1x128xbf16>, vector<10x7x128xbf16> -> vector<10x8x128xbf16>
    %24 = vector.extract_strided_slice %20 {offsets = [0, 1, 0], sizes = [10, 7, 128], strides = [1, 1, 1]} : vector<10x8x128xbf16> to vector<10x7x128xbf16>
    %25 = tpu.concatenate %24, %21 in 1 : vector<10x7x128xbf16>, vector<10x1x128xbf16> -> vector<10x8x128xbf16>
    %26 = vector.extract_strided_slice %23 {offsets = [0, 0, 0], sizes = [8, 8, 128], strides = [1, 1, 1]} : vector<10x8x128xbf16> to vector<8x8x128xbf16>
    %27 = vector.extract_strided_slice %20 {offsets = [0, 0, 0], sizes = [8, 8, 128], strides = [1, 1, 1]} : vector<10x8x128xbf16> to vector<8x8x128xbf16>
    %28 = vector.extract_strided_slice %25 {offsets = [0, 0, 0], sizes = [8, 8, 128], strides = [1, 1, 1]} : vector<10x8x128xbf16> to vector<8x8x128xbf16>
    %29 = vector.extract_strided_slice %23 {offsets = [1, 0, 0], sizes = [8, 8, 128], strides = [1, 1, 1]} : vector<10x8x128xbf16> to vector<8x8x128xbf16>
    %30 = vector.extract_strided_slice %20 {offsets = [1, 0, 0], sizes = [8, 8, 128], strides = [1, 1, 1]} : vector<10x8x128xbf16> to vector<8x8x128xbf16>
    %31 = vector.extract_strided_slice %25 {offsets = [1, 0, 0], sizes = [8, 8, 128], strides = [1, 1, 1]} : vector<10x8x128xbf16> to vector<8x8x128xbf16>
    %32 = vector.extract_strided_slice %23 {offsets = [2, 0, 0], sizes = [8, 8, 128], strides = [1, 1, 1]} : vector<10x8x128xbf16> to vector<8x8x128xbf16>
    %33 = vector.extract_strided_slice %20 {offsets = [2, 0, 0], sizes = [8, 8, 128], strides = [1, 1, 1]} : vector<10x8x128xbf16> to vector<8x8x128xbf16>
    %34 = vector.extract_strided_slice %25 {offsets = [2, 0, 0], sizes = [8, 8, 128], strides = [1, 1, 1]} : vector<10x8x128xbf16> to vector<8x8x128xbf16>
    %35 = tpu.concatenate %26, %27, %28, %29, %30, %31, %32, %33, %34 in 2 : vector<8x8x128xbf16>, vector<8x8x128xbf16>, vector<8x8x128xbf16>, vector<8x8x128xbf16>, vector<8x8x128xbf16>, vector<8x8x128xbf16>, vector<8x8x128xbf16>, vector<8x8x128xbf16>, vector<8x8x128xbf16> -> vector<8x8x1152xbf16>
    %36 = vector.shape_cast %35 : vector<8x8x1152xbf16> to vector<64x1152xbf16>
    %c0_13 = arith.constant 0 : index
    %c0_14 = arith.constant 0 : index
    %37 = vector.load %arg3[%c0_13, %c0_14] : memref<1152x128xbf16, #tpu.memory_space<vmem>>, vector<1152x128xbf16>
    %cst_15 = arith.constant dense<0.000000e+00> : vector<64x128xf32>
    %38 = tpu.matmul %36, %37, %cst_15 {dimension_numbers = #tpu.dot_dimension_numbers<[1], [0], [0], [1], [0, 0, 1, 1], [], []>} : vector<64x1152xbf16>, vector<1152x128xbf16>, vector<64x128xf32> -> vector<64x128xf32>
    %c0_16 = arith.constant 0 : index
    %c0_17 = arith.constant 0 : index
    %39 = vector.load %arg4[%c0_16, %c0_17] : memref<1x128xf32, #tpu.memory_space<vmem>>, vector<1x128xf32>
    %40 = vector.broadcast %39 : vector<1x128xf32> to vector<64x128xf32>
    %41 = arith.mulf %38, %40 : vector<64x128xf32>
    %c0_18 = arith.constant 0 : index
    %c0_19 = arith.constant 0 : index
    %42 = vector.load %arg5[%c0_18, %c0_19] : memref<1x128xf32, #tpu.memory_space<vmem>>, vector<1x128xf32>
    %43 = vector.broadcast %42 : vector<1x128xf32> to vector<64x128xf32>
    %44 = arith.addf %41, %43 : vector<64x128xf32>
    %cst_20 = arith.constant 0.000000e+00 : f32
    %45 = vector.broadcast %cst_20 : f32 to vector<64x128xf32>
    %46 = arith.maximumf %44, %45 : vector<64x128xf32>
    %47 = vector.shape_cast %46 : vector<64x128xf32> to vector<8x8x128xf32>
    %48 = arith.truncf %47 : vector<8x8x128xf32> to vector<8x8x128xbf16>
    %c0_21 = arith.constant 0 : index
    %c0_22 = arith.constant 0 : index
    %c0_23 = arith.constant 0 : index
    %c0_24 = arith.constant 0 : index
    %49 = vector.load %arg6[%c0_21, %c0_22, %c0_23, %c0_24] : memref<1x8x8x128xbf16, #tpu.memory_space<vmem>>, vector<1x8x8x128xbf16>
    %50 = vector.shape_cast %49 : vector<1x8x8x128xbf16> to vector<8x8x128xbf16>
    %51 = vector.shape_cast %48 : vector<8x8x128xbf16> to vector<1x8x8x128xbf16>
    tpu.vector_store %arg6[%c0_21, %c0_22, %c0_23, %c0_24], %51 {strides = array<i32>} : memref<1x8x8x128xbf16, #tpu.memory_space<vmem>>, vector<1x8x8x128xbf16>,
    return
  }
  func.func @transform_0(%arg0: i32, %arg1: i32) -> (i32, i32, i32, i32) {
    %c0_i32 = arith.constant 0 : i32
    %c0_i32_0 = arith.constant 0 : i32
    %c0_i32_1 = arith.constant 0 : i32
    %c0_i32_2 = arith.constant 0 : i32
    return %arg0, %c0_i32, %c0_i32_0, %c0_i32_1 : i32, i32, i32, i32
  }
  func.func @transform_1(%arg0: i32, %arg1: i32) -> (i32, i32) {
    %c0_i32 = arith.constant 0 : i32
    %c0_i32_0 = arith.constant 0 : i32
    %c0_i32_1 = arith.constant 0 : i32
    return %c0_i32, %c0_i32_0 : i32, i32
  }
  func.func @transform_2(%arg0: i32, %arg1: i32) -> (i32, i32) {
    %c0_i32 = arith.constant 0 : i32
    %c0_i32_0 = arith.constant 0 : i32
    %c0_i32_1 = arith.constant 0 : i32
    return %c0_i32, %c0_i32_0 : i32, i32
  }
  func.func @transform_3(%arg0: i32, %arg1: i32) -> (i32, i32) {
    %c0_i32 = arith.constant 0 : i32
    %c0_i32_0 = arith.constant 0 : i32
    %c0_i32_1 = arith.constant 0 : i32
    return %c0_i32, %c0_i32_0 : i32, i32
  }
  func.func @transform_4(%arg0: i32, %arg1: i32) -> (i32, i32, i32, i32) {
    %c0_i32 = arith.constant 0 : i32
    %c0_i32_0 = arith.constant 0 : i32
    %c0_i32_1 = arith.constant 0 : i32
    return %arg0, %arg1, %c0_i32, %c0_i32_0 : i32, i32, i32, i32
  }
}

</mosaic_0001>

<bundles_post_ra>
// kernel: tpu_custom_call.1
= control target key start
LH: loop header
LB: loop body
LE: loop exit
PB: predicated region body
PF: predicated region fallthrough
CT: control target
= control target key end

     0   :  { %9 = vsyncpa [#allocation3], 0  ;;  %s2740_s0 = inlined_call_operand.hbm [shape: bf16[2,8,8,128], index: 0, kind: input, shape index: {}]   ;;  %s2741_s1 = inlined_call_operand.hbm [shape: bf16[1152,128], index: 1, kind: input, shape index: {}]   ;;  %s2742_s2 = inlined_call_operand.vmem [shape: f32[1,128], index: 2, kind: input, shape index: {}]   ;;  %s2743_s3 = inlined_call_operand.vmem [shape: f32[1,128], index: 3, kind: input, shape index: {}]   ;;  %s2744_s4 = inlined_call_operand.hbm [shape: bf16[2,8,8,128], index: 4, kind: output, shape index: {}]  }
   0x1   :  { %11 = vsyncpa [#allocation3 + $0x1], 0 }
   0x2   :  { %12 = vsyncpa [#allocation6], 0 }
   0x3   :  { %13 = vsyncpa [#allocation4], 0 }
   0x4   :  { %15 = vsyncpa [#allocation4 + $0x1], 0  ;;  %s2321_s15 = smov 0   ;;  %s2323_s16 = smov 0  }
   0x5   :  { %s2325_s17 = smov 0   ;;  %s2327_s18 = smov 0  }
   0x6   :  { %s2329_s19 = smov 0   ;;  %s2331_s20 = smov 0  }
   0x7 LB: > { %s1611_s21 = sadd.s32 4294967295, %s2286_s20   ;;  %s1612_s22 = sadd.s32 4294967294, %s2286_s20   ;;  %s2286_s20 = sphi %s2331_s20, %s21_s20   ;;  %s2282_s19 = sphi %s2329_s19, %s2772_s19   ;;  %s2278_s18 = sphi %s2327_s18, %s2771_s18   ;;  %s2274_s17 = sphi %s2325_s17, %s2770_s17   ;;  %s2270_s16 = sphi %s2323_s16, %s2769_s16   ;;  %s2266_s15 = sphi %s2321_s15, %s2768_s15  }
   0x8   : > { %p53_p0 = scmp.ne.s32.totalorder %s2270_s16, %s2266_s15  ;;  %p2355_p1 = scmp.eq.s32.totalorder %s1611_s21, 0 }
   0x9   : > { %p2359_p2 = scmp.eq.s32.totalorder %s1611_s21, 1  ;;  %p148_p3 = scmp.eq.s32.totalorder %s1612_s22, 1 }
   0xa   : > { %s2749_s23 = scalar_select %p2355_p1, 1, 0 }
   0xb   : > { %s2750_s24 = scalar_select %p2359_p2, 1, 0 }
   0xc   : > { %p2365_p4 = por %p2355_p1, %p53_p0  ;;  %p1613_p5 = scmp.ge.s32.totalorder %s2286_s20, 1 }
   0xd   : > { %p2370_p6 = por %p148_p3, %p53_p0  ;;  %p155_p7 = scmp.lt.s32.totalorder %s2286_s20, 3 }
   0xe   : > { %s2751_s25 = scalar_select %p2365_p4, 1, 0 }
   0xf   : > { %s2752_s26 = scalar_select %p2370_p6, 1, 0 }
  0x10   : > { %p2375_p8 = pnand %p1613_p5, %p155_p7  ;;  %s2288_s28 = smov [#allocation5]  }
  0x11   : > { %s167_s29 = sshll.u32 %s2288_s28, 4  ;;  %s33_s5 = sadd.s32 1, %s2282_s19  ;;  %s168_s29 = int_to_ptr.vmem [resolvable:$true] %s167_s29 }
  0x12   : > { %s2753_s27 = scalar_select %p2375_p8, 1, 0 }
  0x13   : > { %p1985_p9 = pneg %p2375_p8  ;;  %s2142_s8 = scalar_lea.hbm %s2741_s1, 9216 }
  0x14   : > { %p2143_p12 = scmp.ne.s32.totalorder %s2741_s1, %s2142_s8  ;;  %p2149_p5 = scmp.lt.u32.totalorder %s2142_s8, %s2741_s1 }
  0x15   : > { %p2384_p11 = pnand %p1985_p9, %p2355_p1 }
  0x17   : > { %p2144_p13 = pneg %p2384_p11 }
  0x19   : > { %p2145_p0 = pnand %p2144_p13, %p2143_p12 }
  0x1b   : > { %p2146_p3 = pneg %p2145_p0 }
  0x1d   : > { %p2151_p7 = pnand %p2149_p5, %p2146_p3 }
  0x1f   : > { %2154 = shalt.err (!%p2151_p7)
}
  0x20   : > { %s2155_s13 = scalar_lea.vmem %s168_s29, 9216  ;;  %p2163_p1 = scmp.lt.s32.totalorder %s168_s29, %s168_s29 }
  0x21   : > { %p2156_p9 = scmp.ne.s32.totalorder %s168_s29, %s2155_s13  ;;  %p2164_p4 = scmp.lt.s32.totalorder %s2155_s13, %s2155_s13 }
  0x23   : > { %p2158_p10 = pnand %p2156_p9, %p2144_p13  ;;  %p2165_p8 = por %p2164_p4, %p2163_p1 }
  0x25   : > { %p2159_p6 = pneg %p2158_p10 }
  0x27   : > { %p2166_p2 = pnand %p2165_p8, %p2159_p6 }
  0x29   : > { %2169 = shalt.err (!%p2166_p2)
}
  0x2a   : > { %s2289_s14 = smov 64   ;;  %s2290_s21 = smov 4  }
  0x2b   : > { %1988 = dma.hbm_to_vmem [thread:$0]  (!%p2384_p11), %s2741_s1, 9216, %s168_s29, [#allocation6], %s2289_s14, %s2289_s14, %s2290_s21  }
  0x2c   : > { %p35_p1 = scmp.ge.s32.totalorder %s33_s5, 2  ;;  %s40_s6 = sadd.s32 1, %s2274_s17 }
  0x2d   : > { %p47_p2 = scmp.ne.s32.totalorder %s2274_s17, %s2270_s16  ;;  %p48_p4 = scmp.eq.s32.totalorder %s2286_s20, 0 }
  0x2e   : > { %s2774_s5 = smov (%p35_p1, %s33_s5), 0  ;;  %p2756_p8 = scmp.ne.s32.totalorder %s2750_s24, 0 }
  0x2f   : > { %p2414_p6 = por %p48_p4, %p47_p2  ;;  %s37_s8 = ssub.s32 %s2282_s19, %s2774_s5 }
  0x30   : > { %p2420_p10 = por %p2756_p8, %p47_p2  ;;  %p1998_p12 = scmp.lt.s32.totalorder %s2286_s20, 2 }
  0x31   : > { %p38_p11 = scmp.eq.s32.totalorder %s37_s8, 0  ;;  %s187_s29 = sand.u32 1, %s2274_s17  }
  0x32   : > { %s1616_s9 = sshll.u32 %s187_s29, 5  ;;  %s1740_s11 = sshll.u32 %s2282_s19, 9 }
  0x33   : > { %s2429_s10 = scalar_select %p38_p11, %s2274_s17, %s40_s6  }
  0x34   : > { %s2435_s22 = scalar_lea.hbm %s2740_s0, %s1740_s11  ;;  %s191_s24 = scalar_lea.vmem [#allocation2], %s1616_s9 }
  0x35   : > { %s198_s28 = sshll.u32 %s191_s24, 4  ;;  %p2441_p13 = pnand %p1998_p12, %p2414_p6  ;;  %s2437_s28 = int_to_ptr.vmem [resolvable:$true] %s198_s28 }
  0x36   : > { %s2445_s6 = scalar_lea.sflag [#allocation3], %s187_s29  ;;  %s2170_s12 = scalar_lea.hbm %s2435_s22, 512 }
  0x37   : > { %p2171_p0 = scmp.ne.s32.totalorder %s2435_s22, %s2170_s12  ;;  %p2172_p3 = pneg %p2441_p13 }
  0x38   : > { %s2175_s7 = scalar_lea.hbm %s2740_s0, 1024  ;;  %p2176_p9 = scmp.lt.u32.totalorder %s2435_s22, %s2740_s0 }
  0x39   : > { %p2173_p5 = pnand %p2172_p3, %p2171_p0  ;;  %p2177_p1 = scmp.lt.u32.totalorder %s2175_s7, %s2170_s12 }
  0x3a   : > { %p2179_p4 = scmp.lt.u32.totalorder %s2170_s12, %s2435_s22 }
  0x3b   : > { %p2174_p7 = pneg %p2173_p5  ;;  %p2178_p2 = por %p2177_p1, %p2176_p9 }
  0x3d   : > { %p2180_p6 = por %p2179_p4, %p2178_p2 }
  0x3f   : > { %p2181_p8 = pnand %p2180_p6, %p2174_p7 }
  0x41   : > { %2184 = shalt.err (!%p2181_p8)
}
  0x42   : > { %s2185_s29 = scalar_lea.vmem %s2437_s28, 512  ;;  %s2291_s9 = smov [#allocation2]  }
  0x43   : > { %p2186_p12 = scmp.ne.s32.totalorder %s2437_s28, %s2185_s29  ;;  %s2190_s11 = sshll.u32 %s2291_s9, 4  ;;  %s2191_s11 = int_to_ptr.vmem [resolvable:$false] %s2190_s11 }
  0x44   : > { %s2192_s13 = scalar_lea.vmem %s2191_s11, 1024  ;;  %p2193_p5 = scmp.lt.s32.totalorder %s2437_s28, %s2191_s11 }
  0x45   : > { %p2188_p11 = pnand %p2186_p12, %p2172_p3  ;;  %p2194_p9 = scmp.lt.s32.totalorder %s2192_s13, %s2185_s29 }
  0x47   : > { %p2189_p0 = pneg %p2188_p11  ;;  %p2195_p1 = por %p2194_p9, %p2193_p5 }
  0x49   : > { %p2196_p2 = pnand %p2195_p1, %p2189_p0 }
  0x4b   : > { %2199 = shalt.err (!%p2196_p2)
}
  0x4c   : > { %1992 = dma.hbm_to_vmem [thread:$0]  (!%p2441_p13), %s2435_s22, 512, %s2437_s28, %s2445_s6, %s2289_s14, %s2289_s14, %s2290_s21  }
  0x4d   : > { %p2759_p3 = scmp.ne.s32.totalorder %s2753_s27, 0 }
  0x4e   : > { %s2479_s12 = sand.u32 (!%p2759_p3), 1, %s2270_s16   ;;  %p2760_p7 = scmp.ne.s32.totalorder (!%p2759_p3), %s2751_s25, 0 }
  0x4f   : > { %210 = sbr.rel (%p2759_p3) target bundleno = 429 (0x1ad), region = 36  ;;  %s1620_s7 = sshll.u32 (!%p2759_p3), %s2479_s12, 5 }
  0x50   : > { %s213_s24 = scalar_lea.sflag (!%p2759_p3), [#allocation3], %s2479_s12  ;;  %s2485_s8 = scalar_lea.vmem (!%p2759_p3), [#allocation2], %s1620_s7 }
  0x56   : > { %2253 = dma.done.wait (%p2760_p7), %s213_s24, 512  }
  0x57   : > { %2255 = vsyncadd (%p2760_p7), %s213_s24, 4294966784  ;;  %p2761_p13 = scmp.ne.s32.totalorder %s2749_s23, 0 }
  0x59   : > { %2257 = dma.done.wait (%p2761_p13), [#allocation6], 9216  }
  0x5a   : > { %2259 = vsyncadd (%p2761_p13), [#allocation6], 4294958080  ;;  %v2055_v0 = vld [vmem:[#allocation5 + $0x40] sm:$0xff]   ;;  %v2059_v4 = vld [vmem:[#allocation5 + $0x48] sm:$0xff]   ;;  %vm391_vm0 = vsmask.f32 256 }
  0x5b   : > { %v2056_v1 = vld [vmem:[#allocation5 + $0xc0] sm:$0xff]   ;;  %1765 = vmatprep.subr.bf16.mxu0 %v2055_v0  ;;  %v2060_v5 = vld [vmem:[#allocation5 + $0xc8] sm:$0xff]   ;;  %v2063_v8 = vld [vmem:[#allocation5 + $0x50] sm:$0xff]   ;;  %v2292_v21 = vmov 0   ;;  %vm390_vm1 = vcmask 1040384   ;;  %vm433_vm4 = vcmask 1043456  }
  0x5c   : > { %v2057_v2 = vld [vmem:[#allocation5] sm:$0xff]   ;;  %1805 = vmatprep.subr.bf16.mxu1 %v2056_v1  ;;  %v2061_v6 = vld [vmem:[#allocation5 + $0x8] sm:$0xff]   ;;  %v2064_v9 = vld [vmem:[#allocation5 + $0xd0] sm:$0xff]   ;;  %v1624_v22 = vcombine.low %v2292_v21, %v2292_v21  ;;  %vm434_vm2 = vsmask.f32 3328  ;;  %s244_s21 = scalar_lea.vmem [#allocation7], %s1620_s7 }
  0x5d   : > { %v2058_v3 = vld [vmem:[#allocation5 + $0x80] sm:$0xff]   ;;  %1766 = vmatpush3.bf16.msra.mxu0 %v2057_v2  ;;  %v2062_v7 = vld [vmem:[#allocation5 + $0x88] sm:$0xff]   ;;  %v2065_v10 = vld [vmem:[#allocation5 + $0x10] sm:$0xff]   ;;  %s1511_s22 = sshll.u32 %s244_s21, 4  ;;  %s1741_s28 = sshll.u32 %s2278_s18, 9  ;;  %s2686_s22 = int_to_ptr.vmem [resolvable:$true] %s1511_s22 }
  0x5e   : > { %1806 = vmatpush3.bf16.msra.mxu1 %v2058_v3  ;;  %1767 = vmatprep.subr.bf16.mxu0 %v2059_v4  ;;  %v2066_v11 = vld [vmem:[#allocation5 + $0x90] sm:$0xff]   ;;  %v2067_v12 = vld [vmem:[#allocation5 + $0x58] sm:$0xff]   ;;  %v2071_v16 = vld [vmem:[#allocation5 + $0x60] sm:$0xff]   ;;  %v311_v27 = vshrl.u32 %v1624_v22, 16  ;;  %v314_v31 = vshll.u32 %v1624_v22, 16  ;;  %s2691_s18 = scalar_lea.hbm %s2744_s4, %s1741_s28  ;;  %s1496_s9 = scalar_lea.sflag [#allocation4], %s2479_s12 }
  0x5f   : > { %1807 = vmatprep.subr.bf16.mxu1 %v2060_v5  ;;  %v2068_v13 = vld [vmem:[#allocation5 + $0xd8] sm:$0xff]   ;;  %v2072_v17 = vld [vmem:[#allocation5 + $0xe0] sm:$0xff]   ;;  %v2075_v20 = vld [vmem:[#allocation5 + $0x68] sm:$0xff]   ;;  %s2200_s11 = scalar_lea.vmem %s2686_s22, 512  ;;  %s2293_s13 = smov [#allocation7]  }
  0x60   : > { %v2069_v14 = vld [vmem:[#allocation5 + $0x18] sm:$0xff]   ;;  %v2073_v18 = vld [vmem:[#allocation5 + $0x20] sm:$0xff]   ;;  %v2076_v23 = vld [vmem:[#allocation5 + $0xe8] sm:$0xff]   ;;  %v313_v34 = vrot.slane %v311_v27, 7  ;;  %v403_v37 = vrot.slane %v314_v31, 1  ;;  %p2201_p4 = scmp.ne.s32.totalorder %s2686_s22, %s2200_s11  ;;  %s2204_s7 = sshll.u32 %s2293_s13, 4  ;;  %s2205_s7 = int_to_ptr.vmem [resolvable:$false] %s2204_s7 }
  0x61   : > { %1768 = vmatpush3.bf16.msra.mxu0 %v2061_v6  ;;  %v2070_v15 = vld [vmem:[#allocation5 + $0x98] sm:$0xff]   ;;  %v2074_v19 = vld [vmem:[#allocation5 + $0xa0] sm:$0xff]   ;;  %v2077_v24 = vld [vmem:[#allocation5 + $0x28] sm:$0xff]   ;;  %s2206_s24 = scalar_lea.vmem %s2205_s7, 1024  ;;  %p2207_p12 = scmp.lt.s32.totalorder %s2686_s22, %s2205_s7 }
  0x62   : > { %1808 = vmatpush3.bf16.msra.mxu1 %v2062_v7  ;;  %1769 = vmatprep.subr.bf16.mxu0 %v2063_v8  ;;  %v2078_v25 = vld [vmem:[#allocation5 + $0xa8] sm:$0xff]   ;;  %v2079_v26 = vld [vmem:[#allocation5 + $0x70] sm:$0xff]   ;;  %vm2498_vm3 = vmand %vm390_vm1, %vm391_vm0  ;;  %v316_v42 = vor.u32 %v314_v31, %v313_v34  ;;  %v404_v48 = vor.u32 %v403_v37, %v311_v27  ;;  %p2202_p6 = pnand %p2201_p4, %p2420_p10  ;;  %p2208_p11 = scmp.lt.s32.totalorder %s2206_s24, %s2200_s11 }
  0x63   : > { %1809 = vmatprep.subr.bf16.mxu1 %v2064_v9  ;;  %v2080_v28 = vld [vmem:[#allocation5 + $0xf0] sm:$0xff]   ;;  %v2083_v33 = vld [vmem:[#allocation5 + $0x78] sm:$0xff]   ;;  %v2503_v39 = vld [vmem:[%s2485_s8] sm:$0xf] }
  0x64   : > { %v2081_v30 = vld [vmem:[#allocation5 + $0x30] sm:$0xff]   ;;  %v2084_v35 = vld [vmem:[#allocation5 + $0xf8] sm:$0xff]   ;;  %v2506_v40 = vld [vmem:[%s2485_s8 + $0x4] sm:$0xf]  ;;  %v1625_v43 = vcombine.low %v2503_v39, %v2503_v39  ;;  %v1635_v44 = vcombine.low %v2292_v21, %v2503_v39  ;;  %v2527_v57 = vsel %vm2498_vm3, 0, %v316_v42  ;;  %p2203_p8 = pneg %p2202_p6  ;;  %p2209_p0 = por %p2208_p11, %p2207_p12 }
  0x65   : > { %1770 = vmatpush3.bf16.msra.mxu0 %v2065_v10  ;;  %v2082_v32 = vld [vmem:[#allocation5 + $0xb0] sm:$0xff]   ;;  %v2085_v36 = vld [vmem:[#allocation5 + $0x38] sm:$0xff]   ;;  %v2509_v41 = vld [vmem:[%s2485_s8 + $0x8] sm:$0xf]  ;;  %v1626_v45 = vcombine.low %v2506_v40, %v2506_v40 }
  0x66   : > { %1810 = vmatpush3.bf16.msra.mxu1 %v2066_v11  ;;  %1771 = vmatprep.subr.bf16.mxu0 %v2067_v12  ;;  %v2086_v38 = vld [vmem:[#allocation5 + $0xb8] sm:$0xff]   ;;  %v2091_v46 = vld [vmem:[#allocation5 + $0x140] sm:$0xff]   ;;  %v1627_v47 = vcombine.low %v2509_v41, %v2509_v41  ;;  %v318_v50 = vshrl.u32 %v1625_v43, 16  ;;  %v321_v51 = vshll.u32 %v1625_v43, 16  ;;  %vm2521_vm5 = vmand %vm433_vm4, %vm434_vm2  ;;  %p2210_p5 = pnand %p2209_p0, %p2203_p8 }
  0x67   : > { %1811 = vmatprep.subr.bf16.mxu1 %v2068_v13  ;;  %v2092_v49 = vld [vmem:[#allocation5 + $0x1c0] sm:$0xff]   ;;  %1148 = vmatprep.mubr.bf16.mxu0 %v1635_v44  ;;  %v325_v52 = vshrl.u32 %v1626_v45, 16  ;;  %v328_v53 = vshll.u32 %v1626_v45, 16  ;;  %v2531_v63 = vsel %vm2521_vm5, %v404_v48, 0  ;;  %v2095_v11 = vld [vmem:[#allocation5 + $0x148] sm:$0xff]   ;;  %v2101_v27 = vld [vmem:[#allocation5 + $0x150] sm:$0xff]  }
  0x68   : > { %v332_v55 = vshrl.u32 %v1627_v47, 16  ;;  %v335_v56 = vshll.u32 %v1627_v47, 16  ;;  %v320_v58 = vrot.slane %v318_v50, 7  ;;  %v405_v60 = vrot.slane %v321_v51, 1  ;;  %v2093_v3 = vld [vmem:[#allocation5 + $0x100] sm:$0xff]   ;;  %v2098_v22 = vld [vmem:[#allocation5 + $0x188] sm:$0xff]  }
  0x69   : > { %1772 = vmatpush3.bf16.msra.mxu0 %v2069_v14  ;;  %v327_v59 = vrot.slane %v325_v52, 7  ;;  %v407_v61 = vrot.slane %v328_v53, 1  ;;  %v2094_v5 = vld [vmem:[#allocation5 + $0x180] sm:$0xff]   ;;  %v2103_v31 = vld [vmem:[#allocation5 + $0x110] sm:$0xff]   ;;  %v2107_v44 = vld [vmem:[#allocation5 + $0x118] sm:$0xff]  }
  0x6a   : > { %1812 = vmatpush3.bf16.msra.mxu1 %v2070_v15  ;;  %1773 = vmatprep.subr.bf16.mxu0 %v2071_v16  ;;  %v334_v62 = vrot.slane %v332_v55, 7  ;;  %v323_v0 = vor.u32 %v321_v51, %v320_v58  ;;  %v406_v2 = vor.u32 %v405_v60, %v318_v50  ;;  %v409_v7 = vrot.slane %v335_v56, 1  ;;  %v2096_v15 = vld [vmem:[#allocation5 + $0x1c8] sm:$0xff]   ;;  %v2104_v34 = vld [vmem:[#allocation5 + $0x190] sm:$0xff]   ;;  %v2108_v48 = vld [vmem:[#allocation5 + $0x198] sm:$0xff]  }
  0x6b   : > { %1813 = vmatprep.subr.bf16.mxu1 %v2072_v17  ;;  %v330_v1 = vor.u32 %v328_v53, %v327_v59  ;;  %v408_v6 = vor.u32 %v407_v61, %v325_v52  ;;  %v2545_v16 = vld [vmem:[%s2485_s8 + $0xc] sm:$0xf]  ;;  %v2573_v45 = vld [vmem:[%s2485_s8 + $0x10] sm:$0xf]  ;;  %v2112_v52 = vld [vmem:[#allocation5 + $0x160] sm:$0xff]  }
  0x6c   : > { %v337_v4 = vor.u32 %v335_v56, %v334_v62  ;;  %v394_v8 = vsel %vm2498_vm3, 0, %v323_v0  ;;  %v2539_v10 = vsel %vm2521_vm5, %v406_v2, 0  ;;  %v2583_v50 = vcombine.low %v2545_v16, %v2573_v45  ;;  %v2114_v61 = vld [vmem:[#allocation5 + $0x120] sm:$0xff]  }
  0x6d   : > { %1774 = vmatpush3.bf16.msra.mxu0 %v2073_v18  ;;  %v395_v9 = vsel %vm2498_vm3, 0, %v330_v1  ;;  %v1634_v12 = vcombine.low %v2527_v57, %v394_v8  ;;  %v1636_v14 = vcombine.low %v2531_v63, %v2539_v10  ;;  %v2097_v18 = vld [vmem:[#allocation5 + $0x108] sm:$0xff]   ;;  %v2115_v2 = vld [vmem:[#allocation5 + $0x1a0] sm:$0xff]  }
  0x6e   : > { %1814 = vmatpush3.bf16.msra.mxu1 %v2074_v19  ;;  %1775 = vmatprep.subr.bf16.mxu0 %v2075_v20  ;;  %v1637_v13 = vcombine.low %v394_v8, %v395_v9  ;;  %v396_v17 = vsel %vm2498_vm3, 0, %v337_v4  ;;  %v2551_v19 = vcombine.low %v2506_v40, %v2509_v41  ;;  %v1628_v20 = vcombine.low %v2545_v16, %v2545_v16  ;;  %v2117_v8 = vld [vmem:[#allocation5 + $0x1e8] sm:$0xff]   ;;  %v2131_v29 = vld [vmem:[#allocation5 + $0x200] sm:$0xff]  }
  0x6f   : > { %1815 = vmatprep.subr.bf16.mxu1 %v2076_v23  ;;  %v410_v23 = vor.u32 %v409_v7, %v332_v55  ;;  %v2113_v55 = vld [vmem:[#allocation5 + $0x1e0] sm:$0xff]  }
  0x70   : > { %1213 = vmatprep.mubr.bf16.mxu1 %v1637_v13 }
  0x71   : > { %1776 = vmatpush3.bf16.msra.mxu0 %v2077_v24  ;;  %v2557_v24 = vsel %vm2521_vm5, %v408_v6, 0 }
  0x72   : > { %1816 = vmatpush3.bf16.msra.mxu1 %v2078_v25  ;;  %1777 = vmatprep.subr.bf16.mxu0 %v2079_v26  ;;  %v339_v25 = vshrl.u32 %v1628_v20, 16  ;;  %v342_v26 = vshll.u32 %v1628_v20, 16 }
  0x73   : > { %1817 = vmatprep.subr.bf16.mxu1 %v2080_v28  ;;  %v2102_v28 = vld [vmem:[#allocation5 + $0x1d0] sm:$0xff]  }
  0x74   : > { %v411_v37 = vrot.slane %v342_v26, 1 }
  0x75   : > { %1778 = vmatpush3.bf16.msra.mxu0 %v2081_v30  ;;  %v341_v30 = vrot.slane %v339_v25, 7 }
  0x76   : > { %1818 = vmatpush3.bf16.msra.mxu1 %v2082_v32  ;;  %1779 = vmatprep.subr.bf16.mxu0 %v2083_v33  ;;  %v2560_v32 = vcombine.low %v395_v9, %v396_v17  ;;  %v2564_v33 = vsel %vm2521_vm5, %v410_v23, 0  ;;  %v412_v53 = vor.u32 %v411_v37, %v339_v25  ;;  %v2118_v9 = vld [vmem:[#allocation5 + $0x128] sm:$0xff]   ;;  %v2611_v23 = vld [vmem:[%s2485_s8 + $0x1c] sm:$0xf] }
  0x77   : > { %1819 = vmatprep.subr.bf16.mxu1 %v2084_v35  ;;  %v344_v35 = vor.u32 %v342_v26, %v341_v30  ;;  %v2570_v43 = vcombine.low %v2557_v24, %v2564_v33 }
  0x78   : > { %v2591_v7 = vsel %vm2521_vm5, %v412_v53, 0 }
  0x79   : > { %1780 = vmatpush3.bf16.msra.mxu0 %v2085_v36  ;;  %v2105_v36 = vld [vmem:[#allocation5 + $0x158] sm:$0xff]   ;;  %v397_v42 = vsel %vm2498_vm3, 0, %v344_v35 }
  0x7a   : > { %1820 = vmatpush3.bf16.msra.mxu1 %v2086_v38  ;;  %1845 = vmatprep.subr.bf16.mxu0 %v2091_v46  ;;  %v2106_v38 = vld [vmem:[#allocation5 + $0x1d8] sm:$0xff]   ;;  %v2576_v46 = vld [vmem:[%s2485_s8 + $0x14] sm:$0xf]  ;;  %v1643_v47 = vcombine.low %v396_v17, %v397_v42 }
  0x7b   : > { %1885 = vmatprep.subr.bf16.mxu1 %v2092_v49  ;;  %v1629_v49 = vcombine.low %v2573_v45, %v2573_v45  ;;  %v1630_v51 = vcombine.low %v2576_v46, %v2576_v46 }
  0x7c   : > { %1149 = vmatmul.mubr.bf16.vlgmr.msra.gmra.mrb[0].mxu0 %v1634_v12 }
  0x7d   : > { %1214 = vmatmul.mubr.bf16.vlgmr.msra.gmra.mrb[0].mxu1 %v1636_v14  ;;  %1846 = vmatpush3.bf16.msra.mxu0 %v2093_v3  ;;  %v346_v56 = vshrl.u32 %v1629_v49, 16  ;;  %v349_v58 = vshll.u32 %v1629_v49, 16  ;;  %v353_v59 = vshrl.u32 %v1630_v51, 16  ;;  %v356_v60 = vshll.u32 %v1630_v51, 16  ;;  %v2116_v3 = vld [vmem:[#allocation5 + $0x168] sm:$0xff]   ;;  %v2127_v49 = vld [vmem:[#allocation5 + $0x178] sm:$0xff]  }
  0x7e   : > { %1886 = vmatpush3.bf16.msra.mxu1 %v2094_v5  ;;  %1847 = vmatprep.subr.bf16.mxu0 %v2095_v11 }
  0x7f   : > { %1887 = vmatprep.subr.bf16.mxu1 %v2096_v15  ;;  %1156 = vmatprep.mubr.bf16.mxu0 %v2551_v19  ;;  %v348_v62 = vrot.slane %v346_v56, 7  ;;  %v355_v0 = vrot.slane %v353_v59, 7  ;;  %v413_v1 = vrot.slane %v349_v58, 1  ;;  %v415_v11 = vrot.slane %v356_v60, 1  ;;  %v2119_v15 = vld [vmem:[#allocation5 + $0x1a8] sm:$0xff]  }
  0x80   : > { %1221 = vmatprep.mubr.bf16.mxu1 %v1643_v47 }
  0x81   : > { %1848 = vmatpush3.bf16.msra.mxu0 %v2097_v18  ;;  %v351_v4 = vor.u32 %v349_v58, %v348_v62  ;;  %v358_v5 = vor.u32 %v356_v60, %v355_v0  ;;  %v414_v6 = vor.u32 %v413_v1, %v346_v56  ;;  %v416_v30 = vor.u32 %v415_v11, %v353_v59  ;;  %v2128_v56 = vld [vmem:[#allocation5 + $0x1f8] sm:$0xff]  }
  0x82   : > { %1888 = vmatpush3.bf16.msra.mxu1 %v2098_v22  ;;  %1849 = vmatprep.subr.bf16.mxu0 %v2101_v27  ;;  %v2608_v22 = vld [vmem:[%s2485_s8 + $0x18] sm:$0xf]  ;;  %v2621_v27 = vcombine.low %v2611_v23, %v2611_v23 }
  0x83   : > { %1889 = vmatprep.subr.bf16.mxu1 %v2102_v28  ;;  %v398_v12 = vsel %vm2498_vm3, 0, %v351_v4  ;;  %v399_v13 = vsel %vm2498_vm3, 0, %v358_v5  ;;  %v2599_v14 = vsel %vm2521_vm5, %v414_v6, 0  ;;  %v1631_v25 = vcombine.low %v2608_v22, %v2608_v22  ;;  %v2123_v28 = vld [vmem:[#allocation5 + $0x170] sm:$0xff]   ;;  %v2129_v58 = vld [vmem:[#allocation5 + $0x138] sm:$0xff]   ;;  %v2132_v5 = vld [vmem:[#allocation5 + $0x208] sm:$0xff]  }
  0x84   : > { %1157 = vmatmul.mubr.bf16.gmra.mrb[4].mxu0 %v2560_v32  ;;  %v1649_v17 = vcombine.low %v398_v12, %v399_v13  ;;  %v2601_v18 = vcombine.low %v397_v42, %v398_v12  ;;  %v2605_v20 = vcombine.low %v2591_v7, %v2599_v14  ;;  %v2617_v26 = vcombine.low %v2576_v46, %v2608_v22  ;;  %v2130_v62 = vld [vmem:[#allocation5 + $0x1b8] sm:$0xff]  }
  0x85   : > { %1850 = vmatpush3.bf16.msra.mxu0 %v2103_v31  ;;  %1222 = vmatmul.mubr.bf16.gmra.mrb[4].mxu1 %v2570_v43  ;;  %v2124_v31 = vld [vmem:[#allocation5 + $0x1f0] sm:$0xff]   ;;  %v363_v35 = vshll.u32 %v1631_v25, 16  ;;  %v370_v37 = vshll.u32 %v2621_v27, 16  ;;  %v1638_v4 = vcombine.low %v2503_v39, %v2506_v40  ;;  %v1645_v6 = vcombine.low %v2564_v33, %v2591_v7  ;;  %v2135_v40 = vld [vmem:[#allocation5 + $0x218] sm:$0xff]   ;;  %v2137_v33 = vld [vmem:[#allocation5 + $0x220] sm:$0xff]  }
  0x86   : > { %1890 = vmatpush3.bf16.msra.mxu1 %v2104_v34  ;;  %1851 = vmatprep.subr.bf16.mxu0 %v2105_v36  ;;  %v360_v34 = vshrl.u32 %v1631_v25, 16  ;;  %v367_v36 = vshrl.u32 %v2621_v27, 16  ;;  %v1656_v54 = vcombine.low %v2608_v22, %v2611_v23 }
  0x87   : > { %1891 = vmatprep.subr.bf16.mxu1 %v2106_v38  ;;  %1164 = vmatprep.mubr.bf16.mxu0 %v2583_v50  ;;  %v2125_v38 = vld [vmem:[#allocation5 + $0x130] sm:$0xff]   ;;  %v417_v47 = vrot.slane %v363_v35, 1  ;;  %v419_v39 = vrot.slane %v370_v37, 1 }
  0x88   : > { %1229 = vmatprep.mubr.bf16.mxu1 %v1649_v17  ;;  %v362_v42 = vrot.slane %v360_v34, 7 }
  0x89   : > { %1852 = vmatpush3.bf16.msra.mxu0 %v2107_v44  ;;  %v369_v44 = vrot.slane %v367_v36, 7  ;;  %v418_v53 = vor.u32 %v417_v47, %v360_v34 }
  0x8a   : > { %1892 = vmatpush3.bf16.msra.mxu1 %v2108_v48  ;;  %1853 = vmatprep.subr.bf16.mxu0 %v2112_v52  ;;  %v2126_v48 = vld [vmem:[#allocation5 + $0x1b0] sm:$0xff]   ;;  %v365_v51 = vor.u32 %v363_v35, %v362_v42 }
  0x8b   : > { %1893 = vmatprep.subr.bf16.mxu1 %v2113_v55  ;;  %v372_v52 = vor.u32 %v370_v37, %v369_v44  ;;  %v442_v55 = vsel %vm2521_vm5, %v416_v30, 0 }
  0x8c   : > { %1165 = vmatmul.mubr.bf16.gmra.mrb[8].mxu0 %v2601_v18  ;;  %v400_v59 = vsel %vm2498_vm3, 0, %v365_v51 }
  0x8d   : > { %1854 = vmatpush3.bf16.msra.mxu0 %v2114_v61  ;;  %1230 = vmatmul.mubr.bf16.gmra.mrb[8].mxu1 %v2605_v20  ;;  %v2634_v60 = vsel %vm2498_vm3, 0, %v372_v52  ;;  %v2638_v61 = vsel %vm2521_vm5, %v418_v53, 0  ;;  %v1652_v1 = vcombine.low %v399_v13, %v400_v59 }
  0x8e   : > { %1894 = vmatpush3.bf16.msra.mxu1 %v2115_v2  ;;  %1855 = vmatprep.subr.bf16.mxu0 %v2116_v3  ;;  %v1655_v0 = vcombine.low %v400_v59, %v2634_v60  ;;  %v2642_v2 = vcombine.low %v442_v55, %v2638_v61  ;;  %v1639_v3 = vcombine.low %v2539_v10, %v2557_v24  ;;  %v2134_v10 = vld [vmem:[#allocation5 + $0x210] sm:$0xff]  }
  0x8f   : > { %1895 = vmatprep.subr.bf16.mxu1 %v2117_v8  ;;  %1172 = vmatprep.mubr.bf16.mxu0 %v2617_v26  ;;  %v1651_v24 = vcombine.low %v2599_v14, %v442_v55  ;;  %v1659_v8 = vcombine.low %v2611_v23, %v2292_v21 }
  0x90   : > { %1237 = vmatprep.mubr.bf16.mxu1 %v1655_v0 }
  0x91   : > { %1856 = vmatpush3.bf16.msra.mxu0 %v2118_v9  ;;  %v2140_v9 = vld [vmem:[#allocation5 + $0x230] sm:$0xff]  }
  0x92   : > { %1896 = vmatpush3.bf16.msra.mxu1 %v2119_v15  ;;  %1857 = vmatprep.subr.bf16.mxu0 %v2123_v28 }
  0x93   : > { %1897 = vmatprep.subr.bf16.mxu1 %v2124_v31 }
  0x94   : > { %1173 = vmatmul.mubr.bf16.gmra.mrb[12].mxu0 %v1652_v1 }
  0x95   : > { %1858 = vmatpush3.bf16.msra.mxu0 %v2125_v38  ;;  %1238 = vmatmul.mubr.bf16.gmra.mrb[12].mxu1 %v2642_v2 }
  0x96   : > { %1898 = vmatpush3.bf16.msra.mxu1 %v2126_v48  ;;  %1859 = vmatprep.subr.bf16.mxu0 %v2127_v49 }
  0x97   : > { %1899 = vmatprep.subr.bf16.mxu1 %v2128_v56  ;;  %1278 = vmatprep.mubr.bf16.mxu0 %v1639_v3 }
  0x98   : > { %1343 = vmatprep.mubr.bf16.mxu1 %v2551_v19  ;;  %v1644_v19 = vcombine.low %v2509_v41, %v2545_v16  ;;  %v1650_v41 = vcombine.low %v2573_v45, %v2576_v46  ;;  %v1658_v45 = vcombine.low %v2634_v60, %v2527_v57  ;;  %v2141_v46 = vld [vmem:[#allocation5 + $0x238] sm:$0xff]  }
  0x99   : > { %1860 = vmatpush3.bf16.msra.mxu0 %v2129_v58 }
  0x9a   : > { %1900 = vmatpush3.bf16.msra.mxu1 %v2130_v62  ;;  %1937 = vmatprep.subr.bf16.mxu0 %v2131_v29 }
  0x9b   : > { %1961 = vmatprep.subr.bf16.mxu1 %v2131_v29 }
  0x9c   : > { %1279 = vmatmul.mubr.bf16.vlgmr.msra.gmra.mrb[16].mxu0 %v1638_v4 }
  0x9d   : > { %1344 = vmatmul.mubr.bf16.vlgmr.msra.gmra.mrb[16].mxu1 %v2560_v32  ;;  %1938 = vmatpush3.bf16.msra.mxu0 %v2131_v29  ;;  %v420_v32 = vor.u32 %v419_v39, %v367_v36 }
  0x9e   : > { %1969 = vmatpush3.bf16.msra.mxu1 %v2131_v29  ;;  %1939 = vmatprep.subr.bf16.mxu0 %v2132_v5 }
  0x9f   : > { %1962 = vmatprep.subr.bf16.mxu1 %v2132_v5  ;;  %1286 = vmatprep.mubr.bf16.mxu0 %v1645_v6  ;;  %v444_v16 = vsel %vm2521_vm5, %v420_v32, 0 }
  0xa0   : > { %1351 = vmatprep.mubr.bf16.mxu1 %v2583_v50  ;;  %v2138_v50 = vld [vmem:[#allocation5 + $0x228] sm:$0xff]   ;;  %v1657_v7 = vcombine.low %v2638_v61, %v444_v16  ;;  %v1660_v21 = vcombine.low %v444_v16, %v2531_v63 }
  0xa1   : > { %1940 = vmatpush3.bf16.msra.mxu0 %v2132_v5 }
  0xa2   : > { %1970 = vmatpush3.bf16.msra.mxu1 %v2132_v5  ;;  %1941 = vmatprep.subr.bf16.mxu0 %v2134_v10 }
  0xa3   : > { %1963 = vmatprep.subr.bf16.mxu1 %v2134_v10 }
  0xa4   : > { %1287 = vmatmul.mubr.bf16.gmra.mrb[20].mxu0 %v1644_v19 }
  0xa5   : > { %1352 = vmatmul.mubr.bf16.gmra.mrb[20].mxu1 %v2601_v18  ;;  %1942 = vmatpush3.bf16.msra.mxu0 %v2134_v10 }
  0xa6   : > { %1971 = vmatpush3.bf16.msra.mxu1 %v2134_v10  ;;  %1943 = vmatprep.subr.bf16.mxu0 %v2135_v40 }
  0xa7   : > { %1964 = vmatprep.subr.bf16.mxu1 %v2135_v40  ;;  %1294 = vmatprep.mubr.bf16.mxu0 %v1651_v24 }
  0xa8   : > { %1359 = vmatprep.mubr.bf16.mxu1 %v2617_v26 }
  0xa9   : > { %1944 = vmatpush3.bf16.msra.mxu0 %v2135_v40 }
  0xaa   : > { %1972 = vmatpush3.bf16.msra.mxu1 %v2135_v40  ;;  %1945 = vmatprep.subr.bf16.mxu0 %v2137_v33 }
  0xab   : > { %1965 = vmatprep.subr.bf16.mxu1 %v2137_v33 }
  0xac   : > { %1295 = vmatmul.mubr.bf16.gmra.mrb[24].mxu0 %v1650_v41 }
  0xad   : > { %1360 = vmatmul.mubr.bf16.gmra.mrb[24].mxu1 %v1652_v1  ;;  %1946 = vmatpush3.bf16.msra.mxu0 %v2137_v33 }
  0xae   : > { %1973 = vmatpush3.bf16.msra.mxu1 %v2137_v33  ;;  %1947 = vmatprep.subr.bf16.mxu0 %v2138_v50 }
  0xaf   : > { %1966 = vmatprep.subr.bf16.mxu1 %v2138_v50  ;;  %1302 = vmatprep.mubr.bf16.mxu0 %v1657_v7 }
  0xb0   : > { %1367 = vmatprep.mubr.bf16.mxu1 %v1659_v8 }
  0xb1   : > { %1948 = vmatpush3.bf16.msra.mxu0 %v2138_v50 }
  0xb2   : > { %1974 = vmatpush3.bf16.msra.mxu1 %v2138_v50  ;;  %1949 = vmatprep.subr.bf16.mxu0 %v2140_v9 }
  0xb3   : > { %1967 = vmatprep.subr.bf16.mxu1 %v2140_v9 }
  0xb4   : > { %1303 = vmatmul.mubr.bf16.gmra.mrb[28].mxu0 %v1656_v54 }
  0xb5   : > { %1368 = vmatmul.mubr.bf16.gmra.mrb[28].mxu1 %v1658_v45  ;;  %1950 = vmatpush3.bf16.msra.mxu0 %v2140_v9 }
  0xb6   : > { %1975 = vmatpush3.bf16.msra.mxu1 %v2140_v9  ;;  %1951 = vmatprep.subr.bf16.mxu0 %v2141_v46 }
  0xb7   : > { %1968 = vmatprep.subr.bf16.mxu1 %v2141_v46  ;;  %1953 = vmatprep.mubr.bf16.mxu0 %v2570_v43 }
  0xb8   : > { %1957 = vmatprep.mubr.bf16.mxu1 %v2642_v2 }
  0xb9   : > { %1952 = vmatpush3.bf16.msra.mxu0 %v2141_v46 }
  0xba   : > { %1976 = vmatpush3.bf16.msra.mxu1 %v2141_v46 }
  0xbc   : > { %1954 = vmatmul.mubr.bf16.vlgmr.msra.gmra.mrb[32].mxu0 %v2605_v20 }
  0xbd   : > { %1958 = vmatmul.mubr.bf16.vlgmr.msra.gmra.mrb[32].mxu1 %v1660_v21 }
 0x14f   : > { %v1781_v57 = vpop.f32.mrb[0].mxu0 }
 0x150   : > { %v1821_v11 = vpop.f32.mrb[0].mxu1  ;;  %v1782_v12 = vpop.f32.mrb[1].mxu0 }
 0x151   : > { %v1783_v13 = vadd.f32 %v1782_v12, %v1781_v57  ;;  %v1822_v14 = vpop.f32.mrb[1].mxu1  ;;  %v1784_v15 = vpop.f32.mrb[2].mxu0 }
 0x152   : > { %v1823_v17 = vadd.f32 %v1822_v14, %v1821_v11  ;;  %v1824_v18 = vpop.f32.mrb[2].mxu1  ;;  %v1785_v22 = vpop.f32.mrb[3].mxu0 }
 0x153   : > { %v1786_v23 = vadd.f32 %v1785_v22, %v1784_v15  ;;  %v1825_v43 = vpop.f32.mrb[3].mxu1 }
 0x154   : > { %v1216_v25 = vadd.f32 %v1823_v17, %v1783_v13  ;;  %v1826_v26 = vadd.f32 %v1825_v43, %v1824_v18 }
 0x156   : > { %v1219_v27 = vadd.f32 %v1826_v26, %v1786_v23 }
 0x157   : > { %v1787_v63 = vpop.f32.mrb[4].mxu0 }
 0x158   : > { %v1788_v28 = vpop.f32.mrb[5].mxu0  ;;  %v1827_v20 = vpop.f32.mrb[4].mxu1 }
 0x159   : > { %v1789_v30 = vadd.f32 %v1788_v28, %v1787_v63  ;;  %v1790_v31 = vpop.f32.mrb[6].mxu0  ;;  %v1828_v35 = vpop.f32.mrb[5].mxu1 }
 0x15a   : > { %v1791_v34 = vpop.f32.mrb[7].mxu0  ;;  %v1829_v37 = vadd.f32 %v1828_v35, %v1827_v20  ;;  %v1830_v38 = vpop.f32.mrb[6].mxu1 }
 0x15b   : > { %v1792_v36 = vadd.f32 %v1791_v34, %v1790_v31  ;;  %v1831_v42 = vpop.f32.mrb[7].mxu1 }
 0x15c   : > { %v1224_v44 = vadd.f32 %v1829_v37, %v1789_v30  ;;  %v1832_v47 = vadd.f32 %v1831_v42, %v1830_v38 }
 0x15e   : > { %v1227_v48 = vadd.f32 %v1832_v47, %v1792_v36 }
 0x15f   : > { %v1793_v49 = vpop.f32.mrb[8].mxu0 }
 0x160   : > { %v1833_v51 = vpop.f32.mrb[8].mxu1  ;;  %v1794_v52 = vpop.f32.mrb[9].mxu0 }
 0x161   : > { %v1795_v53 = vadd.f32 %v1794_v52, %v1793_v49  ;;  %v1834_v55 = vpop.f32.mrb[9].mxu1  ;;  %v1796_v56 = vpop.f32.mrb[10].mxu0 }
 0x162   : > { %v1835_v58 = vadd.f32 %v1834_v55, %v1833_v51  ;;  %v1836_v59 = vpop.f32.mrb[10].mxu1  ;;  %v1797_v60 = vpop.f32.mrb[11].mxu0 }
 0x163   : > { %v1798_v61 = vadd.f32 %v1797_v60, %v1796_v56  ;;  %v1837_v62 = vpop.f32.mrb[11].mxu1 }
 0x164   : > { %v1232_v0 = vadd.f32 %v1835_v58, %v1795_v53  ;;  %v1838_v1 = vadd.f32 %v1837_v62, %v1836_v59 }
 0x166   : > { %v1235_v2 = vadd.f32 %v1838_v1, %v1798_v61 }
 0x167   : > { %v1799_v3 = vpop.f32.mrb[12].mxu0 }
 0x168   : > { %v1839_v29 = vpop.f32.mrb[12].mxu1  ;;  %v1800_v4 = vpop.f32.mrb[13].mxu0 }
 0x169   : > { %v1801_v5 = vadd.f32 %v1800_v4, %v1799_v3  ;;  %v1840_v6 = vpop.f32.mrb[13].mxu1  ;;  %v1802_v10 = vpop.f32.mrb[14].mxu0 }
 0x16a   : > { %v1841_v19 = vadd.f32 %v1840_v6, %v1839_v29  ;;  %v1842_v39 = vpop.f32.mrb[14].mxu1  ;;  %v1803_v40 = vpop.f32.mrb[15].mxu0 }
 0x16b   : > { %v1804_v24 = vadd.f32 %v1803_v40, %v1802_v10  ;;  %v1843_v32 = vpop.f32.mrb[15].mxu1 }
 0x16c   : > { %v1240_v33 = vadd.f32 %v1841_v19, %v1801_v5  ;;  %v1844_v41 = vadd.f32 %v1843_v32, %v1842_v39 }
 0x16e   : > { %v1243_v16 = vadd.f32 %v1844_v41, %v1804_v24 }
 0x16f   : > { %v1861_v50 = vpop.f32.mrb[16].mxu0 }
 0x170   : > { %v1901_v7 = vpop.f32.mrb[16].mxu1  ;;  %v1862_v8 = vpop.f32.mrb[17].mxu0 }
 0x171   : > { %v1863_v9 = vadd.f32 %v1862_v8, %v1861_v50  ;;  %v1902_v54 = vpop.f32.mrb[17].mxu1  ;;  %v1864_v45 = vpop.f32.mrb[18].mxu0 }
 0x172   : > { %v1903_v46 = vadd.f32 %v1902_v54, %v1901_v7  ;;  %v1904_v21 = vpop.f32.mrb[18].mxu1  ;;  %v1865_v57 = vpop.f32.mrb[19].mxu0 }
 0x173   : > { %v1281_v11 = vadd.f32 %v1863_v9, %v1216_v25  ;;  %v1866_v12 = vadd.f32 %v1865_v57, %v1864_v45  ;;  %v1905_v13 = vpop.f32.mrb[19].mxu1 }
 0x174   : > { %v1906_v14 = vadd.f32 %v1905_v13, %v1904_v21  ;;  %v1734_v21 = vld [vmem:[%s2743_s3] ss:$0 sm:$0xff] }
 0x175   : > { %v1284_v15 = vadd.f32 %v1866_v12, %v1219_v27  ;;  %v1346_v17 = vadd.f32 %v1903_v46, %v1281_v11 }
 0x177   : > { %v1867_v18 = vpop.f32.mrb[20].mxu0  ;;  %v2674_v22 = vadd.f32 %v1906_v14, %v1284_v15 }
 0x178   : > { %v1907_v23 = vpop.f32.mrb[20].mxu1  ;;  %v1868_v43 = vpop.f32.mrb[21].mxu0 }
 0x179   : > { %v1869_v26 = vadd.f32 %v1868_v43, %v1867_v18  ;;  %v1908_v63 = vpop.f32.mrb[21].mxu1  ;;  %v1870_v28 = vpop.f32.mrb[22].mxu0 }
 0x17a   : > { %v1909_v30 = vadd.f32 %v1908_v63, %v1907_v23  ;;  %v1910_v31 = vpop.f32.mrb[22].mxu1  ;;  %v1871_v20 = vpop.f32.mrb[23].mxu0 }
 0x17b   : > { %v1289_v34 = vadd.f32 %v1869_v26, %v1224_v44  ;;  %v1872_v35 = vadd.f32 %v1871_v20, %v1870_v28  ;;  %v1911_v36 = vpop.f32.mrb[23].mxu1 }
 0x17c   : > { %v1912_v25 = vadd.f32 %v1911_v36, %v1910_v31 }
 0x17d   : > { %v1292_v37 = vadd.f32 %v1872_v35, %v1227_v48  ;;  %v1354_v38 = vadd.f32 %v1909_v30, %v1289_v34 }
 0x17f   : > { %v1873_v42 = vpop.f32.mrb[24].mxu0  ;;  %v1357_v27 = vadd.f32 %v1912_v25, %v1292_v37 }
 0x180   : > { %v1913_v47 = vpop.f32.mrb[24].mxu1  ;;  %v1874_v49 = vpop.f32.mrb[25].mxu0 }
 0x181   : > { %v1875_v51 = vadd.f32 %v1874_v49, %v1873_v42  ;;  %v1914_v52 = vpop.f32.mrb[25].mxu1  ;;  %v1876_v53 = vpop.f32.mrb[26].mxu0 }
 0x182   : > { %v1915_v55 = vadd.f32 %v1914_v52, %v1913_v47  ;;  %v1916_v56 = vpop.f32.mrb[26].mxu1  ;;  %v1877_v58 = vpop.f32.mrb[27].mxu0 }
 0x183   : > { %v1297_v59 = vadd.f32 %v1875_v51, %v1232_v0  ;;  %v1878_v60 = vadd.f32 %v1877_v58, %v1876_v53  ;;  %v1917_v61 = vpop.f32.mrb[27].mxu1 }
 0x184   : > { %v1918_v62 = vadd.f32 %v1917_v61, %v1916_v56 }
 0x185   : > { %v1300_v44 = vadd.f32 %v1878_v60, %v1235_v2  ;;  %v1362_v1 = vadd.f32 %v1915_v55, %v1297_v59  ;;  %v1733_v2 = vld [vmem:[%s2742_s2] ss:$0 sm:$0xff] }
 0x187   : > { %v1879_v3 = vpop.f32.mrb[28].mxu0  ;;  %v1365_v29 = vadd.f32 %v1918_v62, %v1300_v44 }
 0x188   : > { %v1919_v48 = vpop.f32.mrb[28].mxu1  ;;  %v1880_v4 = vpop.f32.mrb[29].mxu0 }
 0x189   : > { %v1881_v5 = vadd.f32 %v1880_v4, %v1879_v3  ;;  %v1920_v6 = vpop.f32.mrb[29].mxu1  ;;  %v1882_v10 = vpop.f32.mrb[30].mxu0 }
 0x18a   : > { %v1921_v19 = vadd.f32 %v1920_v6, %v1919_v48  ;;  %v1922_v39 = vpop.f32.mrb[30].mxu1  ;;  %v1883_v40 = vpop.f32.mrb[31].mxu0 }
 0x18b   : > { %v1305_v24 = vadd.f32 %v1881_v5, %v1240_v33  ;;  %v1884_v32 = vadd.f32 %v1883_v40, %v1882_v10  ;;  %v1923_v41 = vpop.f32.mrb[31].mxu1 }
 0x18c   : > { %v1924_v50 = vadd.f32 %v1923_v41, %v1922_v39 }
 0x18d   : > { %v1308_v0 = vadd.f32 %v1884_v32, %v1243_v16  ;;  %v1370_v7 = vadd.f32 %v1921_v19, %v1305_v24 }
 0x18f   : > { %v1955_v8 = vpop.f32.mrb[32].mxu0  ;;  %v1373_v9 = vadd.f32 %v1924_v50, %v1308_v0 }
 0x190   : > { %v1419_v54 = vadd.f32 %v1955_v8, %v1354_v38  ;;  %v1959_v45 = vpop.f32.mrb[32].mxu1  ;;  %v1410_v46 = vpop.f32.mrb[33].mxu0 }
 0x191   : > { %v1435_v57 = vadd.f32 %v1959_v45, %v1370_v7  ;;  %v1411_v33 = vadd.f32 %v1410_v46, %v1346_v17  ;;  %v1426_v11 = vpop.f32.mrb[33].mxu1  ;;  %v1956_v12 = vpop.f32.mrb[34].mxu0 }
 0x192   : > { %v1450_v13 = vmul.f32 %v1733_v2, %v1419_v54  ;;  %v1427_v16 = vadd.f32 %v1426_v11, %v1362_v1  ;;  %v1422_v14 = vadd.f32 %v1956_v12, %v1357_v27  ;;  %v1960_v15 = vpop.f32.mrb[34].mxu1  ;;  %v1413_v18 = vpop.f32.mrb[35].mxu0 }
 0x193   : > { %v1454_v23 = vmul.f32 %v1733_v2, %v1435_v57  ;;  %v1448_v43 = vmul.f32 %v1733_v2, %v1411_v33  ;;  %v1438_v26 = vadd.f32 %v1960_v15, %v1373_v9  ;;  %v1414_v63 = vadd.f32 %v1413_v18, %v2674_v22  ;;  %v1429_v28 = vpop.f32.mrb[35].mxu1 }
 0x194   : > { %v1465_v30 = vadd.f32 %v1734_v21, %v1450_v13  ;;  %v1452_v31 = vmul.f32 %v1733_v2, %v1427_v16  ;;  %v1451_v20 = vmul.f32 %v1733_v2, %v1422_v14  ;;  %v1430_v34 = vadd.f32 %v1429_v28, %v1365_v29 }
 0x195   : > { %v1469_v17 = vadd.f32 %v1734_v21, %v1454_v23  ;;  %v1463_v35 = vadd.f32 %v1734_v21, %v1448_v43  ;;  %v1455_v36 = vmul.f32 %v1733_v2, %v1438_v26  ;;  %v1449_v25 = vmul.f32 %v1733_v2, %v1414_v63 }
 0x196   : > { %v1467_v37 = vadd.f32 %v1734_v21, %v1452_v31  ;;  %v1466_v38 = vadd.f32 %v1734_v21, %v1451_v20  ;;  %v1453_v42 = vmul.f32 %v1733_v2, %v1430_v34  ;;  %v1473_v49 = vmax.f32 %v1465_v30, 0.0 }
 0x197   : > { %v1470_v27 = vadd.f32 %v1734_v21, %v1455_v36  ;;  %v1464_v47 = vadd.f32 %v1734_v21, %v1449_v25  ;;  %v1477_v52 = vmax.f32 %v1469_v17, 0.0  ;;  %v1471_v53 = vmax.f32 %v1463_v35, 0.0 }
 0x198   : > { %v1474_v22 = vmax.f32 %v1466_v38, 0.0  ;;  %v1468_v51 = vadd.f32 %v1734_v21, %v1453_v42  ;;  %v1475_v58 = vmax.f32 %v1467_v37, 0.0 }
 0x199   : > { %v1478_v55 = vmax.f32 %v1470_v27, 0.0  ;;  %v1472_v56 = vmax.f32 %v1464_v47, 0.0 }
 0x19a   : > { %v1750_v59 = vpack.c.bf16 %v1474_v22, %v1473_v49  ;;  %v1476_v60 = vmax.f32 %v1468_v51, 0.0 }
 0x19b   : > { %v1760_v61 = vpack.c.bf16 %v1478_v55, %v1477_v52  ;;  %v1745_v62 = vpack.c.bf16 %v1472_v56, %v1471_v53 }
 0x19c   : > { %1762 = vst [vmem:[%s244_s21 + $0x8] sm:$0xff] %v1750_v59   ;;  %v1755_v44 = vpack.c.bf16 %v1476_v60, %v1475_v58 }
 0x19d   : > { %1764 = vst [vmem:[%s244_s21 + $0x18] sm:$0xff] %v1760_v61   ;;  %1746 = vst [vmem:[%s244_s21] sm:$0xff] %v1745_v62  }
 0x19e   : > { %1763 = vst [vmem:[%s244_s21 + $0x10] sm:$0xff] %v1755_v44  }
 0x19f   : > { %2213 = shalt.err (!%p2210_p5)
}
 0x1a0   : > { %s2214_s8 = scalar_lea.hbm %s2691_s18, 512  ;;  %s2218_s27 = scalar_lea.hbm %s2744_s4, 1024 }
 0x1a1   : > { %p2215_p9 = scmp.ne.s32.totalorder %s2691_s18, %s2214_s8  ;;  %p2219_p3 = scmp.lt.u32.totalorder %s2691_s18, %s2744_s4 }
 0x1a2   : > { %p2220_p7 = scmp.lt.u32.totalorder %s2218_s27, %s2214_s8  ;;  %p2222_p4 = scmp.lt.u32.totalorder %s2214_s8, %s2691_s18 }
 0x1a3   : > { %p2216_p1 = pnand %p2215_p9, %p2420_p10 }
 0x1a4   : > { %p2221_p13 = por %p2220_p7, %p2219_p3 }
 0x1a5   : > { %p2217_p2 = pneg %p2216_p1 }
 0x1a6   : > { %p2223_p6 = por %p2222_p4, %p2221_p13 }
 0x1a8   : > { %p2224_p8 = pnand %p2223_p6, %p2217_p2 }
 0x1aa   : > { %2227 = shalt.err (!%p2224_p8)
}
 0x1ab   : > { %s2294_s28 = smov 64   ;;  %s2295_s6 = smov 4  }
 0x1ac   : > { %1983 = dma.vmem_to_hbm [thread:$0]  (%p2420_p10), %s2686_s22, 512, %s2691_s18, %s1496_s9, %s2294_s28, %s2294_s28, %s2295_s6  }
 0x1ad PF: > { %s1526_s29 = sand.u32 1, %s2266_s15   ;;  %p2766_p12 = scmp.ne.s32.totalorder %s2752_s26, 0 }
 0x1ae   : > { %p2767_p11 = scmp.ge.s32.totalorder %s2286_s20, 2  ;;  %s1527_s11 = scalar_lea.sflag [#allocation4], %s1526_s29 }
 0x1b0   : > { %p1994_p0 = pnand %p2767_p11, %p2766_p12 }
 0x1b2   : > { %2261 = dma.done.wait (!%p1994_p0), %s1527_s11, 512  }
 0x1b3   : > { %2263 = vsyncadd (!%p1994_p0), %s1527_s11, 4294966784  ;;  %s21_s20 = sadd.s32 1, %s2286_s20   ;;  %s2768_s15 = smov %s2270_s16 }
 0x1b4   : > { %p18_p5 = scmp.ge.s32.totalorder %s21_s20, 4   ;;  %s2769_s16 = smov %s2274_s17 }
 0x1b5   : > { %s2770_s17 = smov %s2429_s10  ;;  %s2771_s18 = smov %s2282_s19 }
 0x1b6   : > { %s2772_s19 = smov %s2774_s5  ;;  %20 = sbr.rel (!%p18_p5) target bundleno = 7 (0x7), region = 88 }
 0x1bd   :  { %1532 = vsyncpa [#allocation3], 1 }
 0x1be   :  { %1534 = vsyncpa [#allocation3 + $0x1], 1 }
 0x1bf   :  { %1535 = vsyncpa [#allocation6], 1 }
 0x1c0   :  { %1536 = vsyncpa [#allocation4], 1 }
 0x1c1   :  { %1538 = vsyncpa [#allocation4 + $0x1], 1 }

</bundles_post_ra>
